<compile_context>
chip_gen: v6e
topology: v6e:2x2x1
jax: 0.10.0
libtpu: 0.0.40
codegen_flags: <defaults>
</compile_context>

<pallas_src>
import jax
import jax.numpy as jnp
import numpy as np
from jax.experimental import pallas as pl
from jax.experimental.pallas import tpu as pltpu

_EPS = 1e-5  # nn.BatchNorm2d default eps


# ---------------------------------------------------------------- kernels ----
def _embed_stats_kernel(x_ref, w_ref, pos_ref, y_ref, sum_ref, sq_ref):
    """Phase 1: y = x + W@x + pos for one (C, THW) tile + per-channel partial stats."""
    x = x_ref[...]                                            # (C, THW) f32, lanes = THW
    conv = jnp.dot(                                           # (C_out, C) @ (C, THW) on MXU
        w_ref[...].astype(jnp.bfloat16),
        x.astype(jnp.bfloat16),
        preferred_element_type=jnp.float32,
    )
    y = x + conv + pos_ref[...]                               # pos already holds bias+pos_h+pos_w
    y_ref[...] = y
    # one-pass BatchNorm statistics: per-channel sum and sum of squares
    sum_ref[...] = jnp.sum(y, axis=1, keepdims=True)          # (C, 1)
    sq_ref[...] = jnp.sum(y * y, axis=1, keepdims=True)       # (C, 1)


def _normalize_kernel(y_ref, scale_ref, shift_ref, o_ref):
    """Phase 2: in-place affine normalization  out = y * scale[c] + shift[c]."""
    o_ref[...] = y_ref[...] * scale_ref[...] + shift_ref[...]


# ---------------------------------------------------------------- wrapper ----
def _pick_hw_tile(hw: int, c: int, max_block_bytes: int = 2 << 20) -> int:
    """Largest lane tile that divides hw, is 128-aligned, and keeps one (c, tile)
    f32 block under max_block_bytes (so 2-deep buffering fits v7x VMEM).
    Falls back to the full extent (always a legal BlockSpec) if hw isn't 128-aligned."""
    if hw % 128 != 0:
        return hw
    budget = max(128, ((max_block_bytes // (4 * c)) // 128) * 128)
    t = min(hw, budget)
    while hw % t:
        t -= 128
    return t


@jax.jit
def position_embedding_forward(x_nchw, params):
    """x_nchw: (B, n_hidden, H, W) float32 — same NCHW layout as the PyTorch module."""
    B, C, H, W = x_nchw.shape
    HW = H * W
    x = x_nchw.reshape(B, C, HW)          # free reshape (minor dims merged), stays NCHW

    # Fused additive table: pos[c, h*W + w] = embed_h[h, c] + embed_w[w, c] + conv_b[c]
    pos = params["embed_h"][:, None, :] + params["embed_w"][None, :, :]       # (H, W, C)
    pos = jnp.transpose(pos, (2, 0, 1)).reshape(C, HW) + params["conv_b"][:, None]

    thw = _pick_hw_tile(HW, C)
    n_j = HW // thw
    grid = (B, n_j)
    cparams = pltpu.CompilerParams(
        dimension_semantics=("parallel", "parallel"),   # both axes independent (v7x 2 TCs)
        vmem_limit_bytes=32 * 1024 * 1024,
    )

    row_spec = pl.BlockSpec((None, C, thw), lambda b, j: (b, 0, j))
    stat_spec = pl.BlockSpec((None, None, C, 1), lambda b, j: (b, j, 0, 0))

    # ---- phase 1: embed + conv + pos, emit partial BN statistics ----
    y, psum, psq = pl.pallas_call(
        _embed_stats_kernel,
        grid=grid,
        in_specs=[
            row_spec,                                         # x tile (C, THW)
            pl.BlockSpec((C, C), lambda b, j: (0, 0)),        # conv weight (out, in)
            pl.BlockSpec((C, thw), lambda b, j: (0, j)),      # fused pos table tile
        ],
        out_specs=(row_spec, stat_spec, stat_spec),
        out_shape=(
            jax.ShapeDtypeStruct((B, C, HW), jnp.float32),
            jax.ShapeDtypeStruct((B, n_j, C, 1), jnp.float32),
            jax.ShapeDtypeStruct((B, n_j, C, 1), jnp.float32),
        ),
        compiler_params=cparams,
    )(x, params["conv_w"], pos)

    # ---- tiny O(C) reduction + fold BN gamma/beta into scale/shift (in XLA) ----
    inv_n = 1.0 / float(B * HW)
    s = jnp.sum(psum, axis=(0, 1))[:, 0]                      # (C,)
    ss = jnp.sum(psq, axis=(0, 1))[:, 0]                      # (C,)
    mean = s * inv_n
    var = jnp.maximum(ss * inv_n - mean * mean, 0.0)          # biased var (training-mode BN)
    inv = jax.lax.rsqrt(var + _EPS)
    scale = (params["bn_gamma"] * inv)[:, None]               # (C, 1)
    shift = (params["bn_beta"] - mean * params["bn_gamma"] * inv)[:, None]

    # ---- phase 2: normalize in place (output aliases y) ----
    out = pl.pallas_call(
        _normalize_kernel,
        grid=grid,
        in_specs=[
            row_spec,
            pl.BlockSpec((C, 1), lambda b, j: (0, 0)),
            pl.BlockSpec((C, 1), lambda b, j: (0, 0)),
        ],
        out_specs=row_spec,
        out_shape=jax.ShapeDtypeStruct((B, C, HW), x_nchw.dtype),
        input_output_aliases={0: 0},
        compiler_params=cparams,
    )(y, scale, shift)

    # TODO(synk): nn.Dropout(0.1) is applied as identity (eval mode); training-mode
    # dropout would use pltpu.prng_seed / pltpu.prng_random_bits inside phase 2.
    return out.reshape(B, C, H, W)                            # free reshape back to NCHW


# ------------------------------------------------------------------- test ----
def init_params(key, n_hidden, H, W):
    """Deterministic synthetic parameters (shapes follow the module __init__)."""
    ks = jax.random.split(key, 6)
    return dict(
        conv_w=0.05 * jax.random.normal(ks[0], (n_hidden, n_hidden), jnp.float32),  # Conv2d 1x1 (out,in)
        conv_b=0.05 * jax.random.normal(ks[1], (n_hidden,), jnp.float32),
        embed_h=0.02 * jax.random.normal(ks[2], (H, n_hidden), jnp.float32),         # nn.Embedding(H, D)
        embed_w=0.02 * jax.random.normal(ks[3], (W, n_hidden), jnp.float32),         # nn.Embedding(W, D)
        bn_gamma=1.0 + 0.1 * jax.random.normal(ks[4], (n_hidden,), jnp.float32),
        bn_beta=0.1 * jax.random.normal(ks[5], (n_hidden,), jnp.float32),
    )


def reference_forward(x, p):
    """Pure-JAX reference mirroring the PyTorch forward (dropout = identity).
    Uses the same bf16-in/f32-acc matmul precision as the kernel."""
    conv = jnp.einsum(
        "oc,bchw->bohw",
        p["conv_w"].astype(jnp.bfloat16),
        x.astype(jnp.bfloat16),
        preferred_element_type=jnp.float32,
    ) + p["conv_b"][None, :, None, None]
    pos_h = jnp.transpose(p["embed_h"])[None, :, :, None]     # (1, D, H, 1)
    pos_w = jnp.transpose(p["embed_w"])[None, :, None, :]     # (1, D, 1, W)
    y = x + conv + pos_h + pos_w
    mean = jnp.mean(y, axis=(0, 2, 3), keepdims=True)
    var = jnp.mean(jnp.square(y - mean), axis=(0, 2, 3), keepdims=True)
    yn = (y - mean) / jnp.sqrt(var + _EPS)
    return yn * p["bn_gamma"][None, :, None, None] + p["bn_beta"][None, :, None, None]


if __name__ == "__main__":
    B, n_hidden, H, W = 2, 32, 16, 16
    key = jax.random.PRNGKey(0)
    kx, kp = jax.random.split(key)

    x = jax.random.normal(kx, (B, n_hidden, H, W), jnp.float32)
    params = init_params(kp, n_hidden, H, W)

    out = jax.block_until_ready(position_embedding_forward(x, params))

    ref = reference_forward(x, params)
    assert out.shape == x.shape and out.dtype == x.dtype
    np.testing.assert_allclose(np.asarray(out), np.asarray(ref), rtol=2e-3, atol=2e-3)
    print("KERNEL_OK")
</pallas_src>

<mosaic_0001>
module attributes {stable_mosaic.version = 11 : i64} {
  func.func @_embed_stats_kernel(%arg0: i32, %arg1: i32, %arg2: memref<1x32x256xf32, #tpu.memory_space<vmem>>, %arg3: memref<32x32xf32, #tpu.memory_space<vmem>>, %arg4: memref<32x256xf32, #tpu.memory_space<vmem>>, %arg5: memref<1x32x256xf32, #tpu.memory_space<vmem>>, %arg6: memref<1x1x32x1xf32, #tpu.memory_space<vmem>>, %arg7: memref<1x1x32x1xf32, #tpu.memory_space<vmem>>) attributes {dimension_semantics = [#tpu.dimension_semantics<parallel>, #tpu.dimension_semantics<parallel>], iteration_bounds = array<i64: 2, 1>, scalar_prefetch = 0 : i64, scratch_operands = 0 : i64, tpu.core_type = #tpu.core_type<tc>, window_params = [{transform_indices = @transform_0, window_bounds = array<i64: 1, 32, 256>}, {pipeline_mode = #tpu.pipeline_mode<synchronous>, transform_indices = @transform_1, window_bounds = array<i64: 32, 32>}, {transform_indices = @transform_2, window_bounds = array<i64: 32, 256>}, {transform_indices = @transform_3, window_bounds = array<i64: 1, 32, 256>}, {transform_indices = @transform_4, window_bounds = array<i64: 1, 1, 32, 1>}, {transform_indices = @transform_5, window_bounds = array<i64: 1, 1, 32, 1>}]} {
    %c0 = arith.constant 0 : index
    %c0_0 = arith.constant 0 : index
    %c0_1 = arith.constant 0 : index
    %0 = vector.load %arg2[%c0, %c0_0, %c0_1] : memref<1x32x256xf32, #tpu.memory_space<vmem>>, vector<1x32x256xf32>
    %1 = vector.shape_cast %0 : vector<1x32x256xf32> to vector<32x256xf32>
    %c0_2 = arith.constant 0 : index
    %c0_3 = arith.constant 0 : index
    %2 = vector.load %arg3[%c0_2, %c0_3] : memref<32x32xf32, #tpu.memory_space<vmem>>, vector<32x32xf32>
    %3 = arith.truncf %2 : vector<32x32xf32> to vector<32x32xbf16>
    %4 = arith.truncf %1 : vector<32x256xf32> to vector<32x256xbf16>
    %cst = arith.constant dense<0.000000e+00> : vector<32x256xf32>
    %5 = tpu.matmul %3, %4, %cst {dimension_numbers = #tpu.dot_dimension_numbers<[1], [0], [0], [1], [0, 0, 1, 1], [], []>} : vector<32x32xbf16>, vector<32x256xbf16>, vector<32x256xf32> -> vector<32x256xf32>
    %6 = arith.addf %1, %5 : vector<32x256xf32>
    %c0_4 = arith.constant 0 : index
    %c0_5 = arith.constant 0 : index
    %7 = vector.load %arg4[%c0_4, %c0_5] : memref<32x256xf32, #tpu.memory_space<vmem>>, vector<32x256xf32>
    %8 = arith.addf %6, %7 : vector<32x256xf32>
    %c0_6 = arith.constant 0 : index
    %c0_7 = arith.constant 0 : index
    %c0_8 = arith.constant 0 : index
    %9 = vector.load %arg5[%c0_6, %c0_7, %c0_8] : memref<1x32x256xf32, #tpu.memory_space<vmem>>, vector<1x32x256xf32>
    %10 = vector.shape_cast %9 : vector<1x32x256xf32> to vector<32x256xf32>
    %11 = vector.shape_cast %8 : vector<32x256xf32> to vector<1x32x256xf32>
    tpu.vector_store %arg5[%c0_6, %c0_7, %c0_8], %11 {strides = array<i32>} : memref<1x32x256xf32, #tpu.memory_space<vmem>>, vector<1x32x256xf32>,
    %cst_9 = arith.constant dense<0.000000e+00> : vector<32xf32>
    %12 = vector.multi_reduction <add>, %8, %cst_9 [1] : vector<32x256xf32> to vector<32xf32>
    %13 = vector.shape_cast %12 : vector<32xf32> to vector<32x1xf32>
    %c0_10 = arith.constant 0 : index
    %c0_11 = arith.constant 0 : index
    %c0_12 = arith.constant 0 : index
    %c0_13 = arith.constant 0 : index
    %14 = vector.load %arg6[%c0_10, %c0_11, %c0_12, %c0_13] : memref<1x1x32x1xf32, #tpu.memory_space<vmem>>, vector<1x1x32x1xf32>
    %15 = vector.shape_cast %14 : vector<1x1x32x1xf32> to vector<32x1xf32>
    %16 = vector.shape_cast %13 : vector<32x1xf32> to vector<1x1x32x1xf32>
    tpu.vector_store %arg6[%c0_10, %c0_11, %c0_12, %c0_13], %16 {strides = array<i32>} : memref<1x1x32x1xf32, #tpu.memory_space<vmem>>, vector<1x1x32x1xf32>,
    %17 = arith.mulf %8, %8 : vector<32x256xf32>
    %cst_14 = arith.constant dense<0.000000e+00> : vector<32xf32>
    %18 = vector.multi_reduction <add>, %17, %cst_14 [1] : vector<32x256xf32> to vector<32xf32>
    %19 = vector.shape_cast %18 : vector<32xf32> to vector<32x1xf32>
    %c0_15 = arith.constant 0 : index
    %c0_16 = arith.constant 0 : index
    %c0_17 = arith.constant 0 : index
    %c0_18 = arith.constant 0 : index
    %20 = vector.load %arg7[%c0_15, %c0_16, %c0_17, %c0_18] : memref<1x1x32x1xf32, #tpu.memory_space<vmem>>, vector<1x1x32x1xf32>
    %21 = vector.shape_cast %20 : vector<1x1x32x1xf32> to vector<32x1xf32>
    %22 = vector.shape_cast %19 : vector<32x1xf32> to vector<1x1x32x1xf32>
    tpu.vector_store %arg7[%c0_15, %c0_16, %c0_17, %c0_18], %22 {strides = array<i32>} : memref<1x1x32x1xf32, #tpu.memory_space<vmem>>, vector<1x1x32x1xf32>,
    return
  }
  func.func @transform_0(%arg0: i32, %arg1: i32) -> (i32, i32, i32) {
    %c0_i32 = arith.constant 0 : i32
    %c0_i32_0 = arith.constant 0 : i32
    return %arg0, %c0_i32, %arg1 : i32, i32, i32
  }
  func.func @transform_1(%arg0: i32, %arg1: i32) -> (i32, i32) {
    %c0_i32 = arith.constant 0 : i32
    %c0_i32_0 = arith.constant 0 : i32
    %c0_i32_1 = arith.constant 0 : i32
    return %c0_i32, %c0_i32_0 : i32, i32
  }
  func.func @transform_2(%arg0: i32, %arg1: i32) -> (i32, i32) {
    %c0_i32 = arith.constant 0 : i32
    %c0_i32_0 = arith.constant 0 : i32
    return %c0_i32, %arg1 : i32, i32
  }
  func.func @transform_3(%arg0: i32, %arg1: i32) -> (i32, i32, i32) {
    %c0_i32 = arith.constant 0 : i32
    %c0_i32_0 = arith.constant 0 : i32
    return %arg0, %c0_i32, %arg1 : i32, i32, i32
  }
  func.func @transform_4(%arg0: i32, %arg1: i32) -> (i32, i32, i32, i32) {
    %c0_i32 = arith.constant 0 : i32
    %c0_i32_0 = arith.constant 0 : i32
    %c0_i32_1 = arith.constant 0 : i32
    return %arg0, %arg1, %c0_i32, %c0_i32_0 : i32, i32, i32, i32
  }
  func.func @transform_5(%arg0: i32, %arg1: i32) -> (i32, i32, i32, i32) {
    %c0_i32 = arith.constant 0 : i32
    %c0_i32_0 = arith.constant 0 : i32
    %c0_i32_1 = arith.constant 0 : i32
    return %arg0, %arg1, %c0_i32, %c0_i32_0 : i32, i32, i32, i32
  }
}

module attributes {stable_mosaic.version = 11 : i64} {
  func.func @_normalize_kernel(%arg0: i32, %arg1: i32, %arg2: memref<1x32x256xf32, #tpu.memory_space<vmem>>, %arg3: memref<32x1xf32, #tpu.memory_space<vmem>>, %arg4: memref<32x1xf32, #tpu.memory_space<vmem>>, %arg5: memref<1x32x256xf32, #tpu.memory_space<vmem>>) attributes {dimension_semantics = [#tpu.dimension_semantics<parallel>, #tpu.dimension_semantics<parallel>], iteration_bounds = array<i64: 2, 1>, scalar_prefetch = 0 : i64, scratch_operands = 0 : i64, tpu.core_type = #tpu.core_type<tc>, window_params = [{transform_indices = @transform_0, window_bounds = array<i64: 1, 32, 256>}, {pipeline_mode = #tpu.pipeline_mode<synchronous>, transform_indices = @transform_1, window_bounds = array<i64: 32, 1>}, {pipeline_mode = #tpu.pipeline_mode<synchronous>, transform_indices = @transform_2, window_bounds = array<i64: 32, 1>}, {transform_indices = @transform_3, window_bounds = array<i64: 1, 32, 256>}]} {
    %c0 = arith.constant 0 : index
    %c0_0 = arith.constant 0 : index
    %c0_1 = arith.constant 0 : index
    %0 = vector.load %arg2[%c0, %c0_0, %c0_1] : memref<1x32x256xf32, #tpu.memory_space<vmem>>, vector<1x32x256xf32>
    %1 = vector.shape_cast %0 : vector<1x32x256xf32> to vector<32x256xf32>
    %c0_2 = arith.constant 0 : index
    %c0_3 = arith.constant 0 : index
    %2 = vector.load %arg3[%c0_2, %c0_3] : memref<32x1xf32, #tpu.memory_space<vmem>>, vector<32x1xf32>
    %3 = vector.broadcast %2 : vector<32x1xf32> to vector<32x256xf32>
    %4 = arith.mulf %1, %3 : vector<32x256xf32>
    %c0_4 = arith.constant 0 : index
    %c0_5 = arith.constant 0 : index
    %5 = vector.load %arg4[%c0_4, %c0_5] : memref<32x1xf32, #tpu.memory_space<vmem>>, vector<32x1xf32>
    %6 = vector.broadcast %5 : vector<32x1xf32> to vector<32x256xf32>
    %7 = arith.addf %4, %6 : vector<32x256xf32>
    %c0_6 = arith.constant 0 : index
    %c0_7 = arith.constant 0 : index
    %c0_8 = arith.constant 0 : index
    %8 = vector.load %arg5[%c0_6, %c0_7, %c0_8] : memref<1x32x256xf32, #tpu.memory_space<vmem>>, vector<1x32x256xf32>
    %9 = vector.shape_cast %8 : vector<1x32x256xf32> to vector<32x256xf32>
    %10 = vector.shape_cast %7 : vector<32x256xf32> to vector<1x32x256xf32>
    tpu.vector_store %arg5[%c0_6, %c0_7, %c0_8], %10 {strides = array<i32>} : memref<1x32x256xf32, #tpu.memory_space<vmem>>, vector<1x32x256xf32>,
    return
  }
  func.func @transform_0(%arg0: i32, %arg1: i32) -> (i32, i32, i32) {
    %c0_i32 = arith.constant 0 : i32
    %c0_i32_0 = arith.constant 0 : i32
    return %arg0, %c0_i32, %arg1 : i32, i32, i32
  }
  func.func @transform_1(%arg0: i32, %arg1: i32) -> (i32, i32) {
    %c0_i32 = arith.constant 0 : i32
    %c0_i32_0 = arith.constant 0 : i32
    %c0_i32_1 = arith.constant 0 : i32
    return %c0_i32, %c0_i32_0 : i32, i32
  }
  func.func @transform_2(%arg0: i32, %arg1: i32) -> (i32, i32) {
    %c0_i32 = arith.constant 0 : i32
    %c0_i32_0 = arith.constant 0 : i32
    %c0_i32_1 = arith.constant 0 : i32
    return %c0_i32, %c0_i32_0 : i32, i32
  }
  func.func @transform_3(%arg0: i32, %arg1: i32) -> (i32, i32, i32) {
    %c0_i32 = arith.constant 0 : i32
    %c0_i32_0 = arith.constant 0 : i32
    return %arg0, %c0_i32, %arg1 : i32, i32, i32
  }
}

</mosaic_0001>

<bundles_post_ra>
// kernel: position_embedding_forward.3
= control target key start
LH: loop header
LB: loop body
LE: loop exit
PB: predicated region body
PF: predicated region fallthrough
CT: control target
= control target key end

     0   :  { %s462_s12 = smov 0   ;;  %s464_s13 = smov 0   ;;  %s523_s0 = inlined_call_operand.vmem [shape: f32[2,32,256], index: 0, kind: input, shape index: {}, may-alias: {0,3}]   ;;  %s524_s1 = inlined_call_operand.vmem [shape: f32[32,1], index: 1, kind: input, shape index: {}]   ;;  %s525_s2 = inlined_call_operand.vmem [shape: f32[32,1], index: 2, kind: input, shape index: {}]   ;;  %s526_s3 = inlined_call_operand.vmem [shape: f32[2,32,256], index: 3, kind: output, shape index: {}, may-alias: {0,3}]  }
   0x1   :  { %s466_s14 = smov 0  }
   0x2 LB: > { %s25_s15 = sadd.s32 1, %s435_s13  ;;  %p381_p0 = scmp.ge.s32.totalorder %s439_s14, 1  ;;  %s439_s14 = sphi %s466_s14, %s13_s14   ;;  %s435_s13 = sphi %s464_s13, %s528_s13   ;;  %s431_s12 = sphi %s462_s12, %s527_s12  }
   0x3   : > { %p27_p1 = scmp.ge.s32.totalorder %s25_s15, 2  ;;  %p158_p2 = scmp.lt.s32.totalorder %s439_s14, 3 }
   0x5   : > { %s530_s15 = smov (%p27_p1, %s25_s15), 0  ;;  %p159_p3 = pnand %p381_p0, %p158_p2 }
   0x6   : > { %p191_p4 = scmp.lt.s32.totalorder (!%p159_p3), %s431_s12, 1 }
   0x7   : > { %162 = sbr.rel (%p159_p3) target bundleno = 154 (0x9a), region = 32 }
   0xc   : > { %v220_v0 = vld [vmem:[%s524_s1 + $0x10] sm:$0xff]  ;;  %v218_v1 = vld [vmem:[%s524_s1] sm:$0xff]  ;;  %v441_v2 = vmov 0   ;;  %v221_v3 = vld [vmem:[%s524_s1 + $0x18] sm:$0xff]  ;;  %s532_s12 = smov (!%p191_p4, %s431_s12), 1 }
   0xd   : > { %416 = vset.pattern.permute.xlu1 %v441_v2  ;;  %415 = vset.pattern.permute.xlu0 %v441_v2  ;;  %v219_v4 = vld [vmem:[%s524_s1 + $0x8] sm:$0xff]  ;;  %v250_v6 = vld [vmem:[%s525_s2] sm:$0xff]  ;;  %v253_v7 = vld [vmem:[%s525_s2 + $0x18] sm:$0xff]  ;;  %s388_s5 = sshll.u32 %s532_s12, 6 }
   0xe   : > { %234 = vperm.xlu1 %416, %v220_v0   ;;  %224 = vperm.xlu0 %415, %v218_v1   ;;  %v251_v5 = vld [vmem:[%s525_s2 + $0x8] sm:$0xff]  ;;  %v252_v8 = vld [vmem:[%s525_s2 + $0x10] sm:$0xff]  ;;  %s198_s8 = scalar_lea.vmem %s523_s0, %s388_s5  ;;  %s208_s11 = scalar_lea.vmem %s526_s3, %s388_s5 }
   0xf   : > { %v210_v11 = vld [vmem:[%s198_s8] sm:$0xff]  ;;  %v211_v12 = vld [vmem:[%s198_s8 + $0x8] sm:$0xff]  ;;  %v212_v15 = vld [vmem:[%s198_s8 + $0x10] sm:$0xff] }
  0x10   : > { %v213_v16 = vld [vmem:[%s198_s8 + $0x18] sm:$0xff]  ;;  %v214_v17 = vld [vmem:[%s198_s8 + $0x20] sm:$0xff]  ;;  %v215_v22 = vld [vmem:[%s198_s8 + $0x28] sm:$0xff] }
  0x11   : > { %v216_v23 = vld [vmem:[%s198_s8 + $0x30] sm:$0xff]  ;;  %v217_v24 = vld [vmem:[%s198_s8 + $0x38] sm:$0xff] }
  0x12   : > { %239 = vperm.xlu1 %416, %v221_v3   ;;  %229 = vperm.xlu0 %415, %v219_v4  }
  0x16   : > { %261 = vperm.xlu1 %416, %v251_v5   ;;  %256 = vperm.xlu0 %415, %v250_v6  }
  0x1a   : > { %271 = vperm.xlu1 %416, %v253_v7   ;;  %266 = vperm.xlu0 %415, %v252_v8  }
  0x89   : > { %v235_v9 = vpop.permute.xlu1 %234  ;;  %v225_v10 = vpop.permute.xlu0 %224 }
  0x8a   : > { %v242_v18 = vmul.f32 %v225_v10, %v210_v11  ;;  %v243_v19 = vmul.f32 %v225_v10, %v211_v12  ;;  %v246_v31 = vmul.f32 %v235_v9, %v214_v17  ;;  %v247_v32 = vmul.f32 %v235_v9, %v215_v22 }
  0x8d   : > { %v240_v13 = vpop.permute.xlu1 %239  ;;  %v230_v14 = vpop.permute.xlu0 %229 }
  0x8e   : > { %v244_v20 = vmul.f32 %v230_v14, %v212_v15  ;;  %v245_v21 = vmul.f32 %v230_v14, %v213_v16  ;;  %v248_v33 = vmul.f32 %v240_v13, %v216_v23  ;;  %v249_v34 = vmul.f32 %v240_v13, %v217_v24 }
  0x91   : > { %v262_v25 = vpop.permute.xlu1 %261  ;;  %v257_v26 = vpop.permute.xlu0 %256 }
  0x92   : > { %v276_v27 = vadd.f32 %v262_v25, %v244_v20  ;;  %v277_v28 = vadd.f32 %v262_v25, %v245_v21  ;;  %v274_v29 = vadd.f32 %v257_v26, %v242_v18  ;;  %v275_v30 = vadd.f32 %v257_v26, %v243_v19 }
  0x94   : > { %284 = vst [vmem:[%s208_s11 + $0x10] sm:$0xff] %v276_v27  ;;  %285 = vst [vmem:[%s208_s11 + $0x18] sm:$0xff] %v277_v28 }
  0x95   : > { %282 = vst [vmem:[%s208_s11] sm:$0xff] %v274_v29  ;;  %283 = vst [vmem:[%s208_s11 + $0x8] sm:$0xff] %v275_v30  ;;  %v272_v35 = vpop.permute.xlu1 %271  ;;  %v267_v36 = vpop.permute.xlu0 %266 }
  0x96   : > { %v280_v37 = vadd.f32 %v272_v35, %v248_v33  ;;  %v281_v38 = vadd.f32 %v272_v35, %v249_v34  ;;  %v278_v39 = vadd.f32 %v267_v36, %v246_v31  ;;  %v279_v40 = vadd.f32 %v267_v36, %v247_v32 }
  0x98   : > { %288 = vst [vmem:[%s208_s11 + $0x30] sm:$0xff] %v280_v37  ;;  %289 = vst [vmem:[%s208_s11 + $0x38] sm:$0xff] %v281_v38 }
  0x99   : > { %286 = vst [vmem:[%s208_s11 + $0x20] sm:$0xff] %v278_v39  ;;  %287 = vst [vmem:[%s208_s11 + $0x28] sm:$0xff] %v279_v40 }
  0x9a PF: > { %s13_s14 = sadd.s32 1, %s439_s14   ;;  %s527_s12 = smov %s435_s13 }
  0x9b   : > { %p10_p5 = scmp.ge.s32.totalorder %s13_s14, 4   ;;  %s528_s13 = smov %s530_s15 }
  0x9d   :  { %12 = sbr.rel (!%p10_p5) target bundleno = 2 (0x2), region = 62 }

// kernel: position_embedding_forward.2
= control target key start
LH: loop header
LB: loop body
LE: loop exit
PB: predicated region body
PF: predicated region fallthrough
CT: control target
= control target key end

     0   :  { %s797_s18 = smov 0   ;;  %s799_s19 = smov 0   ;;  %s898_s0 = inlined_call_operand.vmem [shape: f32[2,32,256], index: 0, kind: input, shape index: {}]   ;;  %s899_s1 = inlined_call_operand.vmem [shape: f32[32,32], index: 1, kind: input, shape index: {}]   ;;  %s900_s2 = inlined_call_operand.vmem [shape: f32[32,256], index: 2, kind: input, shape index: {}]   ;;  %s901_s3 = inlined_call_operand.vmem [shape: f32[2,32,256], index: 3, kind: output, shape index: {0}]   ;;  %s902_s4 = inlined_call_operand.vmem [shape: f32[2,1,32,1], index: 4, kind: output, shape index: {1}]   ;;  %s903_s5 = inlined_call_operand.vmem [shape: f32[2,1,32,1], index: 5, kind: output, shape index: {2}]  }
   0x1   :  { %s801_s20 = smov 0  }
   0x2 LB: > { %s28_s21 = sadd.s32 1, %s760_s19  ;;  %p696_p0 = scmp.ge.s32.totalorder %s764_s20, 1  ;;  %s764_s20 = sphi %s801_s20, %s16_s20   ;;  %s760_s19 = sphi %s799_s19, %s905_s19   ;;  %s756_s18 = sphi %s797_s18, %s904_s18  }
   0x3   : > { %p30_p1 = scmp.ge.s32.totalorder %s28_s21, 2  ;;  %p228_p2 = scmp.lt.s32.totalorder %s764_s20, 3 }
   0x5   : > { %s907_s21 = smov (%p30_p1, %s28_s21), 0  ;;  %p229_p3 = pnand %p696_p0, %p228_p2 }
   0x6   : > { %p288_p4 = scmp.lt.s32.totalorder (!%p229_p3), %s756_s18, 1 }
   0x7   : > { %232 = sbr.rel (%p229_p3) target bundleno = 379 (0x17b), region = 32 }
   0xc   : > { %v766_v0 = vmov 0   ;;  %s909_s18 = smov (!%p288_p4, %s756_s18), 1  ;;  %v340_v12 = vld [vmem:[%s899_s1] sm:$0xff]  ;;  %v341_v14 = vld [vmem:[%s899_s1 + $0x8] sm:$0xff]  ;;  %v342_v15 = vld [vmem:[%s899_s1 + $0x10] sm:$0xff]  ;;  %vm350_vm0 = vcmask 261120  }
   0xd   : > { %389 = vmatprep.mubr.bf16.mxu0 %v766_v0  ;;  %399 = vmatprep.mubr.bf16.mxu1 %v766_v0  ;;  %s709_s22 = sshll.u32 %s909_s18, 6  ;;  %v343_v16 = vld [vmem:[%s899_s1 + $0x18] sm:$0xff]  ;;  %v344_v17 = vpack.c.bf16 %v341_v14, %v340_v12  ;;  %v418_v20 = vld [vmem:[%s900_s2] sm:$0xff]  ;;  %v419_v26 = vld [vmem:[%s900_s2 + $0x8] sm:$0xff]  ;;  %s711_s7 = sshll.u32 %s909_s18, 5  ;;  %vm454_vm1 = vcmask 7168  }
   0xe   : > { %s295_s25 = scalar_lea.vmem %s898_s0, %s709_s22  ;;  %v345_v18 = vpack.c.bf16 %v343_v16, %v342_v15  ;;  %v422_v22 = vld [vmem:[%s900_s2 + $0x20] sm:$0xff]  ;;  %s846_s15 = scalar_lea.vmem %s901_s3, %s709_s22  ;;  %v423_v28 = vld [vmem:[%s900_s2 + $0x28] sm:$0xff]  ;;  %v420_v34 = vld [vmem:[%s900_s2 + $0x10] sm:$0xff] }
   0xf   : > { %v337_v1 = vld [vmem:[%s295_s25 + $0x28] sm:$0xff]  ;;  %v339_v2 = vld [vmem:[%s295_s25 + $0x38] sm:$0xff]  ;;  %v336_v3 = vld [vmem:[%s295_s25 + $0x20] sm:$0xff]  ;;  %s321_s10 = scalar_lea.vmem %s902_s4, %s711_s7  ;;  %s330_s13 = scalar_lea.vmem %s903_s5, %s711_s7 }
  0x10   : > { %v349_v4 = vpack.c.bf16 %v339_v2, %v337_v1  ;;  %v338_v5 = vld [vmem:[%s295_s25 + $0x30] sm:$0xff]  ;;  %v333_v6 = vld [vmem:[%s295_s25 + $0x8] sm:$0xff]  ;;  %v335_v7 = vld [vmem:[%s295_s25 + $0x18] sm:$0xff] }
  0x11   : > { %v348_v8 = vpack.c.bf16 %v338_v5, %v336_v3  ;;  %v347_v9 = vpack.c.bf16 %v335_v7, %v333_v6  ;;  %v332_v10 = vld [vmem:[%s295_s25] sm:$0xff]  ;;  %v334_v11 = vld [vmem:[%s295_s25 + $0x10] sm:$0xff]  ;;  %v421_v42 = vld [vmem:[%s900_s2 + $0x18] sm:$0xff] }
  0x12   : > { %369 = vmatprep.subr.bf16.mxu0 %v349_v4  ;;  %713 = vmatprep.subr.bf16.mxu1 %v349_v4  ;;  %v346_v13 = vpack.c.bf16 %v334_v11, %v332_v10  ;;  %v424_v36 = vld [vmem:[%s900_s2 + $0x30] sm:$0xff]  ;;  %v425_v44 = vld [vmem:[%s900_s2 + $0x38] sm:$0xff] }
  0x13   : > { %370 = vmatpush1.bf16.msra.mxu0 %v348_v8  ;;  %715 = vmatpush1.bf16.msra.mxu1 %v348_v8 }
  0x14   : > { %371 = vmatprep.subr.bf16.mxu0 %v347_v9  ;;  %714 = vmatprep.subr.bf16.mxu1 %v347_v9 }
  0x17   : > { %372 = vmatpush1.bf16.msra.mxu0 %v346_v13  ;;  %716 = vmatpush1.bf16.msra.mxu1 %v346_v13 }
  0x1a   : > { %705 = vmatmul.mubr.msk.bf16.vlgmr.msra.gmra.mxu0 %vm350_vm0, %v344_v17  ;;  %706 = vmatmul.mubr.msk.bf16.vlgmr.msra.gmra.mxu1 %vm350_vm0, %v345_v18 }
  0xda   : > { %v391_v19 = vpop.f32.mrf.mxu0  ;;  %v401_v21 = vpop.f32.mrf.mxu1 }
  0xdb   : > { %v410_v23 = vadd.f32 %v391_v19, %v332_v10  ;;  %v414_v24 = vadd.f32 %v401_v21, %v336_v3 }
  0xdc   : > { %v393_v25 = vpop.f32.mrf.mxu0  ;;  %v403_v27 = vpop.f32.mrf.mxu1 }
  0xdd   : > { %v426_v29 = vadd.f32 %v418_v20, %v410_v23  ;;  %v430_v30 = vadd.f32 %v422_v22, %v414_v24  ;;  %v411_v31 = vadd.f32 %v393_v25, %v333_v6  ;;  %v415_v32 = vadd.f32 %v403_v27, %v337_v1 }
  0xde   : > { %v395_v33 = vpop.f32.mrf.mxu0  ;;  %v405_v35 = vpop.f32.mrf.mxu1 }
  0xdf   : > { %434 = vst [vmem:[%s846_s15] sm:$0xff] %v426_v29  ;;  %438 = vst [vmem:[%s846_s15 + $0x20] sm:$0xff] %v430_v30  ;;  %v427_v37 = vadd.f32 %v419_v26, %v411_v31  ;;  %v431_v38 = vadd.f32 %v423_v28, %v415_v32  ;;  %v412_v39 = vadd.f32 %v395_v33, %v334_v11 }
  0xe0   : > { %v416_v40 = vadd.f32 %v405_v35, %v338_v5  ;;  %v397_v41 = vpop.f32.mrf.mxu0  ;;  %v407_v43 = vpop.f32.mrf.mxu1  ;;  %v459_v54 = vmul.f32 %v426_v29, %v426_v29  ;;  %v463_v0 = vmul.f32 %v430_v30, %v430_v30 }
  0xe1   : > { %435 = vst [vmem:[%s846_s15 + $0x8] sm:$0xff] %v427_v37  ;;  %439 = vst [vmem:[%s846_s15 + $0x28] sm:$0xff] %v431_v38  ;;  %v428_v45 = vadd.f32 %v420_v34, %v412_v39  ;;  %v413_v47 = vadd.f32 %v397_v41, %v335_v7  ;;  %v417_v48 = vadd.f32 %v407_v43, %v339_v2 }
  0xe2   : > { %v432_v46 = vadd.f32 %v424_v36, %v416_v40  ;;  %v448_v49 = vadd.f32 %v431_v38, %v430_v30  ;;  %v442_v50 = vadd.f32 %v427_v37, %v426_v29  ;;  %v460_v51 = vmul.f32 %v427_v37, %v427_v37 }
  0xe3   : > { %436 = vst [vmem:[%s846_s15 + $0x10] sm:$0xff] %v428_v45  ;;  %v429_v52 = vadd.f32 %v421_v42, %v413_v47  ;;  %v433_v53 = vadd.f32 %v425_v44, %v417_v48  ;;  %v461_v58 = vmul.f32 %v428_v45, %v428_v45  ;;  %v464_v62 = vmul.f32 %v431_v38, %v431_v38 }
  0xe4   : > { %440 = vst [vmem:[%s846_s15 + $0x30] sm:$0xff] %v432_v46  ;;  %449 = vadd.xlane.f32.xlu1 %v448_v49  ;;  %443 = vadd.xlane.f32.xlu0 %v442_v50  ;;  %v467_v56 = vadd.f32 %v460_v51, %v459_v54  ;;  %v465_v63 = vmul.f32 %v432_v46, %v432_v46 }
  0xe5   : > { %437 = vst [vmem:[%s846_s15 + $0x18] sm:$0xff] %v429_v52  ;;  %441 = vst [vmem:[%s846_s15 + $0x38] sm:$0xff] %v433_v53  ;;  %v451_v55 = vadd.f32 %v433_v53, %v432_v46  ;;  %v462_v57 = vmul.f32 %v429_v52, %v429_v52  ;;  %v445_v60 = vadd.f32 %v429_v52, %v428_v45 }
  0xe6   : > { %v466_v61 = vmul.f32 %v433_v53, %v433_v53  ;;  %v473_v2 = vadd.f32 %v464_v62, %v463_v0 }
  0xe7   : > { %v470_v59 = vadd.f32 %v462_v57, %v461_v58 }
  0xe8   : > { %452 = vadd.xlane.f32.xlu1 %v451_v55  ;;  %468 = vadd.xlane.f32.xlu0 %v467_v56  ;;  %v476_v1 = vadd.f32 %v466_v61, %v465_v63 }
  0xec   : > { %471 = vadd.xlane.f32.xlu1 %v470_v59  ;;  %446 = vadd.xlane.f32.xlu0 %v445_v60 }
  0xf0   : > { %477 = vadd.xlane.f32.xlu1 %v476_v1  ;;  %474 = vadd.xlane.f32.xlu0 %v473_v2 }
 0x16d   : > { %v450_v3 = vpop.xlane.xlu1 %449  ;;  %v444_v4 = vpop.xlane.xlu0 %443 }
 0x16e   : > { %457 = vst.msk [vmem:[%s321_s10 + $0x10] sm:$0xff] %vm454_vm1, %v450_v3  ;;  %455 = vst.msk [vmem:[%s321_s10] sm:$0xff] %vm454_vm1, %v444_v4 }
 0x171   : > { %v453_v5 = vpop.xlane.xlu1 %452  ;;  %v469_v6 = vpop.xlane.xlu0 %468 }
 0x172   : > { %458 = vst.msk [vmem:[%s321_s10 + $0x18] sm:$0xff] %vm454_vm1, %v453_v5  ;;  %479 = vst.msk [vmem:[%s330_s13] sm:$0xff] %vm454_vm1, %v469_v6 }
 0x175   : > { %v472_v7 = vpop.xlane.xlu1 %471  ;;  %v447_v8 = vpop.xlane.xlu0 %446 }
 0x176   : > { %480 = vst.msk [vmem:[%s330_s13 + $0x8] sm:$0xff] %vm454_vm1, %v472_v7  ;;  %456 = vst.msk [vmem:[%s321_s10 + $0x8] sm:$0xff] %vm454_vm1, %v447_v8 }
 0x179   : > { %v478_v9 = vpop.xlane.xlu1 %477  ;;  %v475_v10 = vpop.xlane.xlu0 %474 }
 0x17a   : > { %482 = vst.msk [vmem:[%s330_s13 + $0x18] sm:$0xff] %vm454_vm1, %v478_v9  ;;  %481 = vst.msk [vmem:[%s330_s13 + $0x10] sm:$0xff] %vm454_vm1, %v475_v10 }
 0x17b PF: > { %s16_s20 = sadd.s32 1, %s764_s20   ;;  %s904_s18 = smov %s760_s19 }
 0x17c   : > { %p13_p5 = scmp.ge.s32.totalorder %s16_s20, 4   ;;  %s905_s19 = smov %s907_s21 }
 0x17e   :  { %15 = sbr.rel (!%p13_p5) target bundleno = 2 (0x2), region = 89 }

</bundles_post_ra>
